<compile_context>
chip_gen: v6e
topology: v6e:2x2x1
jax: 0.10.0
libtpu: 0.0.40
codegen_flags: <defaults>
</compile_context>

<pallas_src>
import functools

import jax
import jax.numpy as jnp
from jax.experimental import pallas as pl
from jax.experimental.pallas import tpu as pltpu


# --------------------------------------------------------------------------- #
# Layout planning
# --------------------------------------------------------------------------- #
_MIN_GRID_STEPS = 4                  # pipelining + megacore (v7x: 2 TCs)
_BLOCK_TARGET_BYTES = 4 << 20        # ~4 MiB of lane-padded f32 input per step
_VMEM_LIMIT = 48 * 1024 * 1024       # <= ~48 MiB: safe on v7x, fine on v5e/v6e


def _round_up(a, m):
    return (a + m - 1) // m * m


def _plan_layout(B, T, C):
    """Lane-fold factor k, folded shapes, batch block bb, padded batch."""
    k = 1
    if 0 < C < 128 and 128 % C == 0:
        k = 128 // C                 # power of two
        while k > 1 and T % k:
            k //= 2
    Tk = T // k
    L = C * k
    # VMEM bytes of one batch row including (8,128) tile padding and f32
    # compute temporaries (worst case).
    per_row = _round_up(max(Tk, 1), 8) * _round_up(L, 128) * 4
    bb = max(1, min(B, _BLOCK_TARGET_BYTES // per_row))
    # keep >= _MIN_GRID_STEPS grid steps whenever B allows it
    bb = min(bb, max(1, B // min(B, _MIN_GRID_STEPS)))
    B_pad = _round_up(B, bb)
    return k, Tk, L, bb, B_pad


def _fold(x, Tk, L, B_pad):
    """(B,T,C) -> (B_pad, Tk, L); pure row-major reshape + optional zero pad."""
    B = x.shape[0]
    xr = x.reshape(B, Tk, L)
    if B_pad != B:
        xr = jnp.pad(xr, ((0, B_pad - B), (0, 0), (0, 0)))
    return xr


# --------------------------------------------------------------------------- #
# Small in-kernel lane-group helpers (operate on (bb, 1, k*C) arrays only)
# --------------------------------------------------------------------------- #
def _lane_group_mean(p, k, C):
    """(bb,1,k*C) partial means per lane slot -> (bb,1,C) full means."""
    if k == 1:
        return p
    acc = p[:, :, 0:C]
    for g in range(1, k):
        acc = acc + p[:, :, g * C:(g + 1) * C]
    return acc * (1.0 / k)


def _lane_group_tile(s, k):
    """(bb,1,C) -> (bb,1,k*C), repeating the feature vector k times."""
    if k == 1:
        return s
    return jnp.concatenate([s] * k, axis=-1)


# --------------------------------------------------------------------------- #
# Kernels
# --------------------------------------------------------------------------- #
def _norm_kernel(x_ref, w_ref, b_ref, *out_refs,
                 eps, affine, subtract_last, write_y, group, feat):
    if write_y:
        y_ref, center_ref, std_ref = out_refs
    else:
        center_ref, std_ref = out_refs

    k, C = group, feat
    x = x_ref[...]                                              # (bb, Tk, L)

    # Per-lane-slot partial mean (f32 accumulation), then reduce across the
    # k time-offset groups folded into the lane axis.
    p_mean = jnp.mean(x, axis=1, keepdims=True, dtype=jnp.float32)   # (bb,1,L)
    mean_c = _lane_group_mean(p_mean, k, C)                          # (bb,1,C)
    mean_e = _lane_group_tile(mean_c, k)                             # (bb,1,L)

    # Two-pass variance (numerically robust), f32 accumulation.
    diff = x.astype(jnp.float32) - mean_e
    p_var = jnp.mean(diff * diff, axis=1, keepdims=True, dtype=jnp.float32)
    var_c = _lane_group_mean(p_var, k, C)                            # (bb,1,C)
    vpe = var_c + eps
    inv_std_c = jax.lax.rsqrt(vpe)                                   # EUP
    std_c = vpe * inv_std_c                                          # sqrt(var+eps)

    if subtract_last:
        center_c = x[:, -1:, (k - 1) * C:].astype(jnp.float32)       # x[:, -1, :]
    else:
        center_c = mean_c

    center_ref[...] = center_c
    std_ref[...] = std_c

    if write_y:
        if affine:
            w = w_ref[...].astype(jnp.float32)[None]                 # (1,1,C)
            b = b_ref[...].astype(jnp.float32)[None]
            scale_c = w * inv_std_c
            shift_c = b - center_c * scale_c
        else:
            scale_c = inv_std_c
            shift_c = -center_c * scale_c
        scale_e = _lane_group_tile(scale_c, k).astype(x.dtype)       # (bb,1,L)
        shift_e = _lane_group_tile(shift_c, k).astype(x.dtype)
        y_ref[...] = (x * scale_e + shift_e).astype(y_ref.dtype)     # one FMA/elem


def _denorm_kernel(x_ref, scale_ref, shift_ref, y_ref):
    x = x_ref[...]                                                   # (bb, Tk, L)
    scale = scale_ref[...].astype(x.dtype)                           # (bb, 1, L)
    shift = shift_ref[...].astype(x.dtype)
    y_ref[...] = (x * scale + shift).astype(y_ref.dtype)             # one FMA/elem


# --------------------------------------------------------------------------- #
# Wrapper
# --------------------------------------------------------------------------- #
class NormalizePallas:
    """JAX/Pallas port of the PyTorch Normalize module.

    Module-level stateful _center/_stdev mirror the PyTorch attributes; for
    jit/vmap composition use the functional _norm_call / _denorm_call methods
    and thread the stats yourself.
    """

    def __init__(self, num_features, eps=1e-5, affine=False,
                 subtract_last=False, non_norm=False):
        self.num_features = num_features
        self.eps = eps
        self.affine = affine
        self.subtract_last = subtract_last
        self.non_norm = non_norm
        # Deterministic init matching nn.Parameter(torch.ones / torch.zeros).
        self.affine_weight = jnp.ones((num_features,), jnp.float32)
        self.affine_bias = jnp.zeros((num_features,), jnp.float32)
        self._center = None      # mean, or `last` if subtract_last  (B,1,C) f32
        self._stdev = None       # sqrt(var + eps)                   (B,1,C) f32

    # ------------------------------------------------------------------ #
    def __call__(self, x, mode):
        if mode == 'norm':
            y, center, std = self._norm_call(x)
            self._center, self._stdev = center, std
            return y
        elif mode == 'denorm':
            if self.non_norm:
                return x
            if self._center is None or self._stdev is None:
                raise RuntimeError("call mode='norm' before mode='denorm'")
            return self._denorm_call(x, self._center, self._stdev)
        else:
            raise NotImplementedError(f"Mode '{mode}' is not implemented.")

    # ------------------------------------------------------------------ #
    def _norm_call(self, x):
        B, T, C = x.shape
        assert C == self.num_features
        k, Tk, L, bb, B_pad = _plan_layout(B, T, C)
        xr = _fold(x, Tk, L, B_pad)
        write_y = not self.non_norm

        kernel = functools.partial(
            _norm_kernel, eps=self.eps, affine=self.affine,
            subtract_last=self.subtract_last, write_y=write_y,
            group=k, feat=C)

        out_shape = []
        out_specs = []
        if write_y:
            out_shape.append(jax.ShapeDtypeStruct((B_pad, Tk, L), x.dtype))
            out_specs.append(pl.BlockSpec((bb, Tk, L), lambda i: (i, 0, 0)))
        out_shape += [jax.ShapeDtypeStruct((B_pad, 1, C), jnp.float32),   # center
                      jax.ShapeDtypeStruct((B_pad, 1, C), jnp.float32)]  # stdev
        out_specs += [pl.BlockSpec((bb, 1, C), lambda i: (i, 0, 0)),
                      pl.BlockSpec((bb, 1, C), lambda i: (i, 0, 0))]

        elem = B_pad * T * C
        cost = pl.CostEstimate(
            flops=8 * elem,
            transcendentals=B_pad * C,
            bytes_accessed=(1 + int(write_y)) * elem * x.dtype.itemsize
                           + 2 * B_pad * C * 4 + 2 * C * 4)

        outs = pl.pallas_call(
            kernel,
            out_shape=tuple(out_shape),
            grid_spec=pltpu.PrefetchScalarGridSpec(
                num_scalar_prefetch=0,
                grid=(B_pad // bb,),
                in_specs=[
                    pl.BlockSpec((bb, Tk, L), lambda i: (i, 0, 0)),
                    pl.BlockSpec((1, C), lambda i: (0, 0)),
                    pl.BlockSpec((1, C), lambda i: (0, 0)),
                ],
                out_specs=tuple(out_specs)),
            compiler_params=pltpu.CompilerParams(
                dimension_semantics=("parallel",),
                vmem_limit_bytes=_VMEM_LIMIT),
            cost_estimate=cost,
        )(xr, self.affine_weight.reshape(1, C), self.affine_bias.reshape(1, C))

        if write_y:
            y, center, std = outs
            y = y[:B].reshape(B, T, C)
        else:
            center, std = outs
            y = x                                    # non_norm: no y HBM write
        return y, center[:B], std[:B]

    # ------------------------------------------------------------------ #
    def _denorm_call(self, x, center, stdev):
        if self.non_norm:
            return x
        B, T, C = x.shape
        assert C == self.num_features
        k, Tk, L, bb, B_pad = _plan_layout(B, T, C)

        # Tiny per-(B,1,C) scale/shift precompute (negligible HBM), then
        # lane-expand to the folded layout so the kernel is a pure FMA stream.
        if self.affine:
            w = self.affine_weight.reshape(1, 1, C)
            b = self.affine_bias.reshape(1, 1, C)
            scale = stdev / (w + self.eps * self.eps)
            shift = center - b * scale
        else:
            scale = stdev
            shift = center
        scale_e = jnp.tile(scale.astype(jnp.float32), (1, 1, k))     # (B,1,L)
        shift_e = jnp.tile(shift.astype(jnp.float32), (1, 1, k))
        if B_pad != B:
            scale_e = jnp.pad(scale_e, ((0, B_pad - B), (0, 0), (0, 0)))
            shift_e = jnp.pad(shift_e, ((0, B_pad - B), (0, 0), (0, 0)))
        xr = _fold(x, Tk, L, B_pad)

        elem = B_pad * T * C
        cost = pl.CostEstimate(
            flops=2 * elem,
            transcendentals=0,
            bytes_accessed=2 * elem * x.dtype.itemsize + 2 * B_pad * L * 4)

        y = pl.pallas_call(
            _denorm_kernel,
            out_shape=jax.ShapeDtypeStruct((B_pad, Tk, L), x.dtype),
            grid_spec=pltpu.PrefetchScalarGridSpec(
                num_scalar_prefetch=0,
                grid=(B_pad // bb,),
                in_specs=[
                    pl.BlockSpec((bb, Tk, L), lambda i: (i, 0, 0)),
                    pl.BlockSpec((bb, 1, L), lambda i: (i, 0, 0)),
                    pl.BlockSpec((bb, 1, L), lambda i: (i, 0, 0)),
                ],
                out_specs=pl.BlockSpec((bb, Tk, L), lambda i: (i, 0, 0))),
            compiler_params=pltpu.CompilerParams(
                dimension_semantics=("parallel",),
                vmem_limit_bytes=_VMEM_LIMIT),
            cost_estimate=cost,
        )(xr, scale_e, shift_e)
        return y[:B].reshape(B, T, C)


# --------------------------------------------------------------------------- #
# Reference + self-test
# --------------------------------------------------------------------------- #
def _ref_stats(x, eps):
    mean = jnp.mean(x, axis=1, keepdims=True)
    var = jnp.mean((x - mean) ** 2, axis=1, keepdims=True)
    return mean, jnp.sqrt(var + eps)


if __name__ == "__main__":
    key = jax.random.PRNGKey(0)
    B, T, C = 4, 8, 32                 # batch=4, seq=8, num_features=32
    # Non-zero mean + scale to exercise the two-pass variance path.
    x = jax.random.normal(key, (B, T, C), dtype=jnp.float32) * 1.5 + 0.7
    mean, std = _ref_stats(x, 1e-5)

    # --- affine=True (weight=1, bias=0 deterministic init) --------------- #
    norm = NormalizePallas(num_features=C, eps=1e-5, affine=True)
    y = jax.block_until_ready(norm(x, mode='norm'))
    y_ref = (x - mean) / std
    assert jnp.allclose(y, y_ref, atol=1e-5, rtol=1e-5)
    x_back = jax.block_until_ready(norm(y, mode='denorm'))
    assert jnp.allclose(x_back, x, atol=1e-4, rtol=1e-4)

    # --- subtract_last=True ---------------------------------------------- #
    norm_sl = NormalizePallas(num_features=C, eps=1e-5, subtract_last=True)
    y_sl = jax.block_until_ready(norm_sl(x, mode='norm'))
    y_sl_ref = (x - x[:, -1:, :]) / std
    assert jnp.allclose(y_sl, y_sl_ref, atol=1e-5, rtol=1e-5)
    x_sl_back = jax.block_until_ready(norm_sl(y_sl, mode='denorm'))
    assert jnp.allclose(x_sl_back, x, atol=1e-4, rtol=1e-4)

    # --- non_norm=True: stats computed, data passed through --------------- #
    norm_nn = NormalizePallas(num_features=C, non_norm=True)
    y_nn = jax.block_until_ready(norm_nn(x, mode='norm'))
    assert jnp.allclose(y_nn, x)
    assert jnp.allclose(norm_nn(x, mode='denorm'), x)

    # --- batch padding path (B=9 -> bb=2, B_pad=10) ------------------------ #
    x2 = jax.random.normal(jax.random.PRNGKey(2), (9, 8, 32), jnp.float32)
    n2 = NormalizePallas(32)
    y2 = jax.block_until_ready(n2(x2, mode='norm'))
    m2, s2 = _ref_stats(x2, 1e-5)
    assert jnp.allclose(y2, (x2 - m2) / s2, atol=1e-5, rtol=1e-5)
    x2_back = jax.block_until_ready(n2(y2, mode='denorm'))
    assert jnp.allclose(x2_back, x2, atol=1e-4, rtol=1e-4)

    # --- C that does not divide 128 (no lane folding) ---------------------- #
    x3 = jax.random.normal(jax.random.PRNGKey(3), (2, 8, 48), jnp.float32)
    n3 = NormalizePallas(48)
    y3 = jax.block_until_ready(n3(x3, mode='norm'))
    m3, s3 = _ref_stats(x3, 1e-5)
    assert jnp.allclose(y3, (x3 - m3) / s3, atol=1e-5, rtol=1e-5)

    print("KERNEL_OK")
</pallas_src>

<mosaic_0001>
module attributes {stable_mosaic.version = 11 : i64} {
  func.func @_norm_kernel(%arg0: i32, %arg1: memref<1x2x128xf32, #tpu.memory_space<vmem>>, %arg2: memref<1x32xf32, #tpu.memory_space<vmem>>, %arg3: memref<1x32xf32, #tpu.memory_space<vmem>>, %arg4: memref<1x2x128xf32, #tpu.memory_space<vmem>>, %arg5: memref<1x1x32xf32, #tpu.memory_space<vmem>>, %arg6: memref<1x1x32xf32, #tpu.memory_space<vmem>>) attributes {dimension_semantics = [#tpu.dimension_semantics<parallel>], iteration_bounds = array<i64: 4>, scalar_prefetch = 0 : i64, scratch_operands = 0 : i64, tpu.core_type = #tpu.core_type<tc>, window_params = [{transform_indices = @transform_0, window_bounds = array<i64: 1, 2, 128>}, {pipeline_mode = #tpu.pipeline_mode<synchronous>, transform_indices = @transform_1, window_bounds = array<i64: 1, 32>}, {pipeline_mode = #tpu.pipeline_mode<synchronous>, transform_indices = @transform_2, window_bounds = array<i64: 1, 32>}, {transform_indices = @transform_3, window_bounds = array<i64: 1, 2, 128>}, {transform_indices = @transform_4, window_bounds = array<i64: 1, 1, 32>}, {transform_indices = @transform_5, window_bounds = array<i64: 1, 1, 32>}]} {
    %c0 = arith.constant 0 : index
    %c0_0 = arith.constant 0 : index
    %c0_1 = arith.constant 0 : index
    %0 = vector.load %arg1[%c0, %c0_0, %c0_1] : memref<1x2x128xf32, #tpu.memory_space<vmem>>, vector<1x2x128xf32>
    %cst = arith.constant dense<0.000000e+00> : vector<1x128xf32>
    %1 = vector.multi_reduction <add>, %0, %cst [1] : vector<1x2x128xf32> to vector<1x128xf32>
    %2 = vector.shape_cast %1 : vector<1x128xf32> to vector<1x1x128xf32>
    %cst_2 = arith.constant 2.000000e+00 : f32
    %3 = vector.broadcast %cst_2 : f32 to vector<1x1x128xf32>
    %4 = arith.divf %2, %3 : vector<1x1x128xf32>
    %5 = vector.extract_strided_slice %4 {offsets = [0, 0, 0], sizes = [1, 1, 32], strides = [1, 1, 1]} : vector<1x1x128xf32> to vector<1x1x32xf32>
    %6 = vector.extract_strided_slice %4 {offsets = [0, 0, 32], sizes = [1, 1, 32], strides = [1, 1, 1]} : vector<1x1x128xf32> to vector<1x1x32xf32>
    %7 = arith.addf %5, %6 : vector<1x1x32xf32>
    %8 = vector.extract_strided_slice %4 {offsets = [0, 0, 64], sizes = [1, 1, 32], strides = [1, 1, 1]} : vector<1x1x128xf32> to vector<1x1x32xf32>
    %9 = arith.addf %7, %8 : vector<1x1x32xf32>
    %10 = vector.extract_strided_slice %4 {offsets = [0, 0, 96], sizes = [1, 1, 32], strides = [1, 1, 1]} : vector<1x1x128xf32> to vector<1x1x32xf32>
    %11 = arith.addf %9, %10 : vector<1x1x32xf32>
    %cst_3 = arith.constant 2.500000e-01 : f32
    %12 = vector.broadcast %cst_3 : f32 to vector<1x1x32xf32>
    %13 = arith.mulf %11, %12 : vector<1x1x32xf32>
    %14 = tpu.concatenate %13, %13, %13, %13 in 2 : vector<1x1x32xf32>, vector<1x1x32xf32>, vector<1x1x32xf32>, vector<1x1x32xf32> -> vector<1x1x128xf32>
    %15 = vector.broadcast %14 : vector<1x1x128xf32> to vector<1x2x128xf32>
    %16 = arith.subf %0, %15 : vector<1x2x128xf32>
    %17 = arith.mulf %16, %16 : vector<1x2x128xf32>
    %cst_4 = arith.constant dense<0.000000e+00> : vector<1x128xf32>
    %18 = vector.multi_reduction <add>, %17, %cst_4 [1] : vector<1x2x128xf32> to vector<1x128xf32>
    %19 = vector.shape_cast %18 : vector<1x128xf32> to vector<1x1x128xf32>
    %cst_5 = arith.constant 2.000000e+00 : f32
    %20 = vector.broadcast %cst_5 : f32 to vector<1x1x128xf32>
    %21 = arith.divf %19, %20 : vector<1x1x128xf32>
    %22 = vector.extract_strided_slice %21 {offsets = [0, 0, 0], sizes = [1, 1, 32], strides = [1, 1, 1]} : vector<1x1x128xf32> to vector<1x1x32xf32>
    %23 = vector.extract_strided_slice %21 {offsets = [0, 0, 32], sizes = [1, 1, 32], strides = [1, 1, 1]} : vector<1x1x128xf32> to vector<1x1x32xf32>
    %24 = arith.addf %22, %23 : vector<1x1x32xf32>
    %25 = vector.extract_strided_slice %21 {offsets = [0, 0, 64], sizes = [1, 1, 32], strides = [1, 1, 1]} : vector<1x1x128xf32> to vector<1x1x32xf32>
    %26 = arith.addf %24, %25 : vector<1x1x32xf32>
    %27 = vector.extract_strided_slice %21 {offsets = [0, 0, 96], sizes = [1, 1, 32], strides = [1, 1, 1]} : vector<1x1x128xf32> to vector<1x1x32xf32>
    %28 = arith.addf %26, %27 : vector<1x1x32xf32>
    %cst_6 = arith.constant 2.500000e-01 : f32
    %29 = vector.broadcast %cst_6 : f32 to vector<1x1x32xf32>
    %30 = arith.mulf %28, %29 : vector<1x1x32xf32>
    %cst_7 = arith.constant 9.99999974E-6 : f32
    %31 = vector.broadcast %cst_7 : f32 to vector<1x1x32xf32>
    %32 = arith.addf %30, %31 : vector<1x1x32xf32>
    %33 = math.rsqrt %32 : vector<1x1x32xf32>
    %34 = arith.mulf %32, %33 : vector<1x1x32xf32>
    %c0_8 = arith.constant 0 : index
    %c0_9 = arith.constant 0 : index
    %c0_10 = arith.constant 0 : index
    %35 = vector.load %arg5[%c0_8, %c0_9, %c0_10] : memref<1x1x32xf32, #tpu.memory_space<vmem>>, vector<1x1x32xf32>
    tpu.vector_store %arg5[%c0_8, %c0_9, %c0_10], %13 {strides = array<i32>} : memref<1x1x32xf32, #tpu.memory_space<vmem>>, vector<1x1x32xf32>,
    %c0_11 = arith.constant 0 : index
    %c0_12 = arith.constant 0 : index
    %c0_13 = arith.constant 0 : index
    %36 = vector.load %arg6[%c0_11, %c0_12, %c0_13] : memref<1x1x32xf32, #tpu.memory_space<vmem>>, vector<1x1x32xf32>
    tpu.vector_store %arg6[%c0_11, %c0_12, %c0_13], %34 {strides = array<i32>} : memref<1x1x32xf32, #tpu.memory_space<vmem>>, vector<1x1x32xf32>,
    %c0_14 = arith.constant 0 : index
    %c0_15 = arith.constant 0 : index
    %37 = vector.load %arg2[%c0_14, %c0_15] : memref<1x32xf32, #tpu.memory_space<vmem>>, vector<1x32xf32>
    %38 = vector.shape_cast %37 : vector<1x32xf32> to vector<1x1x32xf32>
    %c0_16 = arith.constant 0 : index
    %c0_17 = arith.constant 0 : index
    %39 = vector.load %arg3[%c0_16, %c0_17] : memref<1x32xf32, #tpu.memory_space<vmem>>, vector<1x32xf32>
    %40 = vector.shape_cast %39 : vector<1x32xf32> to vector<1x1x32xf32>
    %41 = arith.mulf %38, %33 : vector<1x1x32xf32>
    %42 = arith.mulf %13, %41 : vector<1x1x32xf32>
    %43 = arith.subf %40, %42 : vector<1x1x32xf32>
    %44 = tpu.concatenate %41, %41, %41, %41 in 2 : vector<1x1x32xf32>, vector<1x1x32xf32>, vector<1x1x32xf32>, vector<1x1x32xf32> -> vector<1x1x128xf32>
    %45 = tpu.concatenate %43, %43, %43, %43 in 2 : vector<1x1x32xf32>, vector<1x1x32xf32>, vector<1x1x32xf32>, vector<1x1x32xf32> -> vector<1x1x128xf32>
    %46 = vector.broadcast %44 : vector<1x1x128xf32> to vector<1x2x128xf32>
    %47 = arith.mulf %0, %46 : vector<1x2x128xf32>
    %48 = vector.broadcast %45 : vector<1x1x128xf32> to vector<1x2x128xf32>
    %49 = arith.addf %47, %48 : vector<1x2x128xf32>
    %c0_18 = arith.constant 0 : index
    %c0_19 = arith.constant 0 : index
    %c0_20 = arith.constant 0 : index
    %50 = vector.load %arg4[%c0_18, %c0_19, %c0_20] : memref<1x2x128xf32, #tpu.memory_space<vmem>>, vector<1x2x128xf32>
    tpu.vector_store %arg4[%c0_18, %c0_19, %c0_20], %49 {strides = array<i32>} : memref<1x2x128xf32, #tpu.memory_space<vmem>>, vector<1x2x128xf32>,
    return
  }
  func.func @transform_0(%arg0: i32) -> (i32, i32, i32) {
    %c0_i32 = arith.constant 0 : i32
    %c0_i32_0 = arith.constant 0 : i32
    %c0_i32_1 = arith.constant 0 : i32
    return %arg0, %c0_i32, %c0_i32_0 : i32, i32, i32
  }
  func.func @transform_1(%arg0: i32) -> (i32, i32) {
    %c0_i32 = arith.constant 0 : i32
    %c0_i32_0 = arith.constant 0 : i32
    %c0_i32_1 = arith.constant 0 : i32
    return %c0_i32, %c0_i32_0 : i32, i32
  }
  func.func @transform_2(%arg0: i32) -> (i32, i32) {
    %c0_i32 = arith.constant 0 : i32
    %c0_i32_0 = arith.constant 0 : i32
    %c0_i32_1 = arith.constant 0 : i32
    return %c0_i32, %c0_i32_0 : i32, i32
  }
  func.func @transform_3(%arg0: i32) -> (i32, i32, i32) {
    %c0_i32 = arith.constant 0 : i32
    %c0_i32_0 = arith.constant 0 : i32
    %c0_i32_1 = arith.constant 0 : i32
    return %arg0, %c0_i32, %c0_i32_0 : i32, i32, i32
  }
  func.func @transform_4(%arg0: i32) -> (i32, i32, i32) {
    %c0_i32 = arith.constant 0 : i32
    %c0_i32_0 = arith.constant 0 : i32
    %c0_i32_1 = arith.constant 0 : i32
    return %arg0, %c0_i32, %c0_i32_0 : i32, i32, i32
  }
  func.func @transform_5(%arg0: i32) -> (i32, i32, i32) {
    %c0_i32 = arith.constant 0 : i32
    %c0_i32_0 = arith.constant 0 : i32
    %c0_i32_1 = arith.constant 0 : i32
    return %arg0, %c0_i32, %c0_i32_0 : i32, i32, i32
  }
}

</mosaic_0001>

<bundles_post_ra>
// kernel: tpu_custom_call.1
= control target key start
LH: loop header
LB: loop body
LE: loop exit
PB: predicated region body
PF: predicated region fallthrough
CT: control target
= control target key end

     0   :  { %11 = vsyncpa [#allocation3], 0  ;;  %s1078_s0 = inlined_call_operand.hbm [shape: f32[4,2,128], index: 0, kind: input, shape index: {}]   ;;  %s1079_s1 = inlined_call_operand.vmem [shape: f32[1,32], index: 1, kind: input, shape index: {}]   ;;  %s1080_s2 = inlined_call_operand.vmem [shape: f32[1,32], index: 2, kind: input, shape index: {}]   ;;  %s1081_s3 = inlined_call_operand.hbm [shape: f32[4,2,128], index: 3, kind: output, shape index: {0}]   ;;  %s1082_s4 = inlined_call_operand.hbm [shape: f32[4,1,32], index: 4, kind: output, shape index: {1}]   ;;  %s1083_s5 = inlined_call_operand.hbm [shape: f32[4,1,32], index: 5, kind: output, shape index: {2}]  }
   0x1   :  { %13 = vsyncpa [#allocation3 + $0x1], 0 }
   0x2   :  { %14 = vsyncpa [#allocation4], 0 }
   0x3   :  { %16 = vsyncpa [#allocation4 + $0x1], 0 }
   0x4   :  { %17 = vsyncpa [#allocation7], 0 }
   0x5   :  { %19 = vsyncpa [#allocation7 + $0x1], 0  ;;  %s814_s18 = smov 0   ;;  %s816_s19 = smov 0  }
   0x6   :  { %s818_s20 = smov 0   ;;  %s820_s21 = smov 0  }
   0x7 LB: > { %s835_s22 = sadd.s32 4294967295, %s775_s21   ;;  %s1086_s23 = sadd.s32 4294967294, %s775_s21   ;;  %s775_s21 = sphi %s820_s21, %s1107_s21   ;;  %s771_s20 = sphi %s818_s20, %s1106_s20   ;;  %s767_s19 = sphi %s816_s19, %s1105_s19   ;;  %s763_s18 = sphi %s814_s18, %s1104_s18  }
   0x8   : > { %s839_s24 = sadd.s32 1, %s775_s21   ;;  %s32_s25 = sadd.s32 1, %s771_s20 }
   0x9   : > { %s29_s26 = ssub.s32 %s775_s21, %s839_s24  ;;  %p39_p0 = scmp.ne.s32.totalorder %s771_s20, %s767_s19 }
   0xa   : > { %p30_p1 = scmp.eq.s32.totalorder %s29_s26, 0  ;;  %p40_p2 = scmp.eq.s32.totalorder %s775_s21, 0 }
   0xb   : > { %p45_p3 = scmp.ne.s32.totalorder %s767_s19, %s763_s18  ;;  %p46_p4 = scmp.eq.s32.totalorder %s835_s22, 0 }
   0xc   : > { %s851_s27 = scalar_select %p30_p1, %s771_s20, %s32_s25  }
   0xd   : > { %p853_p5 = por %p40_p2, %p39_p0  ;;  %p857_p6 = por %p46_p4, %p45_p3 }
   0xe   : > { %p111_p7 = scmp.eq.s32.totalorder %s835_s22, 3  ;;  %p117_p8 = scmp.eq.s32.totalorder %s1086_s23, 3 }
   0xf   : > { %s1091_s29 = scalar_select %p857_p6, 1, 0 }
  0x10   : > { %p588_p9 = scmp.lt.s32.totalorder %s775_s21, 4  ;;  %p865_p10 = por %p111_p7, %p39_p0 }
  0x11   : > { %p869_p11 = por %p117_p8, %p45_p3  ;;  %s195_s7 = sand.u32 1, %s771_s20  }
  0x12   : > { %s1092_s30 = scalar_select %p865_p10, 1, 0 }
  0x13   : > { %s1093_s6 = scalar_select %p869_p11, 1, 0 }
  0x14   : > { %s556_s8 = sshll.u32 %s775_s21, 5  ;;  %s555_s9 = sshll.u32 %s195_s7, 1 }
  0x15   : > { %s878_s12 = scalar_lea.hbm %s1078_s0, %s556_s8  ;;  %s199_s13 = scalar_lea.vmem [#allocation2], %s555_s9 }
  0x16   : > { %s206_s14 = sshll.u32 %s199_s13, 4  ;;  %p882_p12 = pnand %p588_p9, %p853_p5  ;;  %s886_s14 = int_to_ptr.vmem [resolvable:$true] %s206_s14 }
  0x17   : > { %s196_s16 = scalar_lea.sflag [#allocation3], %s195_s7  ;;  %s627_s17 = scalar_lea.hbm %s878_s12, 32 }
  0x18   : > { %p628_p1 = scmp.ne.s32.totalorder %s878_s12, %s627_s17  ;;  %p629_p2 = pneg %p882_p12 }
  0x19   : > { %s632_s28 = scalar_lea.hbm %s1078_s0, 128  ;;  %p633_p5 = scmp.lt.s32.totalorder %s878_s12, %s1078_s0 }
  0x1a   : > { %p630_p3 = pnand %p629_p2, %p628_p1  ;;  %p634_p7 = scmp.lt.s32.totalorder %s632_s28, %s627_s17 }
  0x1c   : > { %p631_p4 = pneg %p630_p3  ;;  %p635_p8 = por %p634_p7, %p633_p5 }
  0x1e   : > { %p636_p9 = pnand %p635_p8, %p631_p4 }
  0x20   : > { %639 = shalt.err (!%p636_p9)
}
  0x21   : > { %s640_s7 = scalar_lea.vmem %s886_s14, 32  ;;  %s777_s10 = smov [#allocation2]  }
  0x22   : > { %p641_p13 = scmp.ne.s32.totalorder %s886_s14, %s640_s7  ;;  %s645_s11 = sshll.u32 %s777_s10, 4  ;;  %s646_s11 = int_to_ptr.vmem [resolvable:$false] %s645_s11 }
  0x23   : > { %s647_s13 = scalar_lea.vmem %s646_s11, 64  ;;  %p648_p3 = scmp.lt.s32.totalorder %s886_s14, %s646_s11 }
  0x24   : > { %p643_p0 = pnand %p641_p13, %p629_p2  ;;  %p649_p11 = scmp.lt.s32.totalorder %s647_s13, %s640_s7 }
  0x26   : > { %p644_p1 = pneg %p643_p0  ;;  %p650_p10 = por %p649_p11, %p648_p3 }
  0x28   : > { %p651_p6 = pnand %p650_p10, %p644_p1 }
  0x2a   : > { %654 = shalt.err (!%p651_p6)
}
  0x2b   : > { %577 = dma.hbm_to_vmem [thread:$0]  (!%p882_p12), %s878_s12, 32, %s886_s14, %s196_s16  }
  0x2c   : > { %p1095_p4 = scmp.lt.s32.totalorder %s775_s21, 5  ;;  %p1096_p5 = scmp.ge.s32.totalorder %s775_s21, 1 }
  0x2e   : > { %p212_p13 = pnand %p1096_p5, %p1095_p4 }
  0x2f   : > { %s913_s17 = sand.u32 (!%p212_p13), 1, %s767_s19   ;;  %p1097_p6 = scmp.ne.s32.totalorder (!%p212_p13), %s1091_s29, 0 }
  0x30   : > { %215 = sbr.rel (%p212_p13) target bundleno = 635 (0x27b), region = 32  ;;  %s1087_s25 = sshll.u32 (!%p212_p13), %s913_s17, 1 }
  0x31   : > { %s218_s26 = scalar_lea.sflag (!%p212_p13), [#allocation3], %s913_s17  ;;  %s221_s15 = scalar_lea.vmem (!%p212_p13), [#allocation2], %s1087_s25 }
  0x35   : > { %750 = dma.done.wait (%p1097_p6), %s218_s26, 32  }
  0x36   : > { %752 = vsyncadd (%p1097_p6), %s218_s26, 4294967264  ;;  %vm257_vm0 = vcmask 1041408   ;;  %v923_v0 = vld [vmem:[%s221_s15] sm:$0x3]  ;;  %s778_s12 = smov 96   ;;  %s779_s29 = smov 32   ;;  %v297_v16 = vlaneseq }
  0x37   : > { %v258_v1 = vsel %vm257_vm0, %v923_v0, 0.0  ;;  %s1088_s14 = smov 64   ;;  %vm328_vm1 = vcmask 253952   ;;  %s249_s16 = scalar_lea.vmem [#allocation6], %s913_s17  ;;  %vm291_vm2 = vcmask 261120   ;;  %vm293_vm3 = vcmask 523264  }
  0x38   : > { %v259_v2 = vrot.slane %v258_v1, 4  ;;  %v298_v17 = vshrl.u32 %v297_v16, 7  ;;  %vm295_vm4 = vcmask 785408   ;;  %v331_v44 = vld [vmem:[%s1079_s1] sm:$0x1]  ;;  %s1089_s10 = scalar_lea.vmem [#allocation8], %s913_s17 }
  0x39   : > { %v332_v48 = vld [vmem:[%s1080_s2] sm:$0x1]  ;;  %s386_s11 = sand.u32 1, %s835_s22   ;;  %s562_s13 = sshll.u32 %s835_s22, 4 }
  0x3a   : > { %v260_v3 = vadd.f32 %v259_v2, %v258_v1  ;;  %v938_v21 = vsub.s32 0, %v298_v17  ;;  %s974_s28 = scalar_lea.hbm %s1082_s4, %s562_s13  ;;  %s416_s8 = sshll.u32 %s249_s16, 4  ;;  %s417_s8 = int_to_ptr.vmem [resolvable:$true] %s416_s8 }
  0x3b   : > { %s980_s9 = scalar_lea.sflag [#allocation7], %s386_s11  ;;  %s655_s7 = scalar_lea.vmem %s417_s8, 16 }
  0x3c   : > { %v261_v4 = vrot.slane %v260_v3, 2  ;;  %p656_p10 = scmp.ne.s32.totalorder %s417_s8, %s655_s7  ;;  %p1098_p11 = scmp.ne.s32.totalorder %s1092_s30, 0 }
  0x3d   : > { %s781_s23 = smov [#allocation6]  }
  0x3e   : > { %v262_v5 = vadd.f32 %v261_v4, %v260_v3  ;;  %p657_p12 = pnand %p656_p10, %p1098_p11  ;;  %s659_s25 = sshll.u32 %s781_s23, 4  ;;  %s660_s25 = int_to_ptr.vmem [resolvable:$false] %s659_s25 }
  0x3f   : > { %p662_p2 = scmp.lt.s32.totalorder %s417_s8, %s660_s25 }
  0x40   : > { %v263_v6 = vrot.slane %v262_v5, 1  ;;  %p658_p0 = pneg %p657_p12 }
  0x42   : > { %v264_v7 = vadd.f32 %v263_v6, %v262_v5 }
  0x44   : > { %v266_v8 = vmul.f32 0.5, %v264_v7 }
  0x46   : > { %268 = vrot.lane.b32.xlu0 %v266_v8, %s778_s12  ;;  %276 = vrot.lane.b32.xlu1 %v266_v8, %s779_s29 }
  0x4a   : > { %272 = vrot.lane.b32.xlu0 %v266_v8, %s1088_s14 }
  0xb8   : > { %v269_v9 = vpop.permute.xlu0 %268  ;;  %v277_v12 = vpop.permute.xlu1 %276 }
  0xb9   : > { %v271_v10 = vadd.f32 %v269_v9, %v266_v8 }
  0xbc   : > { %v273_v11 = vpop.permute.xlu0 %272 }
  0xbd   : > { %v275_v13 = vadd.f32 %v273_v11, %v271_v10 }
  0xbf   : > { %v279_v14 = vadd.f32 %v277_v12, %v275_v13 }
  0xc1   : > { %v280_v15 = vmul.f32 0.25, %v279_v14 }
  0xc3   : > { %285 = vrot.lane.b32.xlu0 %v280_v15, %s1088_s14  ;;  %282 = vrot.lane.b32.xlu1 %v280_v15, %s779_s29  ;;  %329 = vst.msk [vmem:[%s249_s16] sm:$0x1] %vm328_vm1, %v280_v15 }
  0xc7   : > { %288 = vrot.lane.b32.xlu1 %v280_v15, %s778_s12 }
 0x135   : > { %v283_v18 = vpop.permute.xlu1 %282  ;;  %v286_v19 = vpop.permute.xlu0 %285 }
 0x136   : > { %v292_v20 = vsel %vm291_vm2, %v280_v15, %v283_v18 }
 0x137   : > { %v294_v22 = vsel %vm293_vm3, %v292_v20, %v286_v19 }
 0x139   : > { %v289_v23 = vpop.permute.xlu1 %288 }
 0x13a   : > { %v296_v24 = vsel %vm295_vm4, %v294_v22, %v289_v23 }
 0x13b   : > { %v300_v25 = vrot.slane %v296_v24, %v938_v21 }
 0x13d   : > { %v301_v26 = vsub.f32 %v923_v0, %v300_v25 }
 0x13f   : > { %v302_v27 = vmul.f32 %v301_v26, %v301_v26 }
 0x141   : > { %v303_v28 = vsel %vm257_vm0, %v302_v27, 0.0 }
 0x142   : > { %v304_v29 = vrot.slane %v303_v28, 4 }
 0x144   : > { %v305_v30 = vadd.f32 %v304_v29, %v303_v28 }
 0x146   : > { %v306_v31 = vrot.slane %v305_v30, 2 }
 0x148   : > { %v307_v32 = vadd.f32 %v306_v31, %v305_v30 }
 0x14a   : > { %v308_v33 = vrot.slane %v307_v32, 1 }
 0x14c   : > { %v309_v34 = vadd.f32 %v308_v33, %v307_v32 }
 0x14e   : > { %v310_v35 = vmul.f32 0.5, %v309_v34 }
 0x150   : > { %316 = vrot.lane.b32.xlu1 %v310_v35, %s1088_s14  ;;  %312 = vrot.lane.b32.xlu0 %v310_v35, %s778_s12 }
 0x154   : > { %320 = vrot.lane.b32.xlu0 %v310_v35, %s779_s29 }
 0x1c2   : > { %v313_v36 = vpop.permute.xlu0 %312  ;;  %v317_v38 = vpop.permute.xlu1 %316 }
 0x1c3   : > { %v315_v37 = vadd.f32 %v313_v36, %v310_v35 }
 0x1c5   : > { %v319_v39 = vadd.f32 %v317_v38, %v315_v37 }
 0x1c6   : > { %v321_v40 = vpop.permute.xlu0 %320 }
 0x1c7   : > { %v323_v41 = vadd.f32 %v321_v40, %v319_v39 }
 0x1c9   : > { %v324_v42 = vmul.f32 0.25, %v323_v41 }
 0x1cb   : > { %v325_v43 = vadd.f32 1e-05, %v324_v42 }
 0x1cd   : > { %625 = vrsqrt.f32 %v325_v43 }
 0x1da   : > { %v626_v45 = vpop.eup %625 }
 0x1db   : > { %v327_v46 = vmul.f32 %v626_v45, %v325_v43  ;;  %v951_v47 = vmul.f32 %v626_v45, %v331_v44 }
 0x1dd   : > { %v340_v49 = vrot.slane %v951_v47, %v938_v21  ;;  %v334_v50 = vmul.f32 %v951_v47, %v280_v15  ;;  %330 = vst.msk [vmem:[%s1089_s10] sm:$0x1] %vm328_vm1, %v327_v46 }
 0x1df   : > { %344 = vrot.lane.b32.xlu0 %v340_v49, %s1088_s14  ;;  %341 = vrot.lane.b32.xlu1 %v340_v49, %s779_s29  ;;  %v967_v51 = vsub.f32 %v332_v48, %v334_v50  ;;  %s661_s14 = scalar_lea.vmem %s660_s25, 32 }
 0x1e0   : > { %p663_p7 = scmp.lt.s32.totalorder %s661_s14, %s655_s7 }
 0x1e1   : > { %v357_v52 = vrot.slane %v967_v51, %v938_v21 }
 0x1e2   : > { %p664_p8 = por %p663_p7, %p662_p2 }
 0x1e4   : > { %p665_p9 = pnand %p664_p8, %p658_p0 }
 0x1e6   : > { %668 = shalt.err (!%p665_p9)
}
 0x1e7   : > { %s669_s16 = scalar_lea.hbm %s974_s28, 16  ;;  %s673_s23 = scalar_lea.hbm %s1082_s4, 64 }
 0x1e8   : > { %p670_p1 = scmp.ne.s32.totalorder %s974_s28, %s669_s16  ;;  %p674_p5 = scmp.lt.s32.totalorder %s974_s28, %s1082_s4 }
 0x1e9   : > { %p675_p13 = scmp.lt.s32.totalorder %s673_s23, %s669_s16 }
 0x1ea   : > { %p671_p3 = pnand %p670_p1, %p1098_p11 }
 0x1eb   : > { %p676_p6 = por %p675_p13, %p674_p5 }
 0x1ec   : > { %p672_p4 = pneg %p671_p3 }
 0x1ee   : > { %p677_p10 = pnand %p676_p6, %p672_p4 }
 0x1f0   : > { %680 = shalt.err (!%p677_p10)
}
 0x1f1   : > { %569 = dma.vmem_to_hbm [thread:$0]  (%p1098_p11), %s417_s8, 16, %s974_s28, %s980_s9   ;;  %347 = vrot.lane.b32.xlu1 %v340_v49, %s778_s12  ;;  %358 = vrot.lane.b32.xlu0 %v357_v52, %s779_s29 }
 0x1f2   : > { %s1006_s10 = scalar_lea.hbm %s1083_s5, %s562_s13  ;;  %s1099_s7 = scalar_lea.vmem [#allocation8], %s913_s17 }
 0x1f3   : > { %s429_s16 = sshll.u32 %s1099_s7, 4  ;;  %s1100_s11 = smov 64   ;;  %s430_s16 = int_to_ptr.vmem [resolvable:$true] %s429_s16 }
 0x1f4   : > { %s681_s26 = scalar_lea.vmem %s430_s16, 16  ;;  %s782_s28 = smov [#allocation8]  }
 0x1f5   : > { %361 = vrot.lane.b32.xlu1 %v357_v52, %s1100_s11  ;;  %364 = vrot.lane.b32.xlu0 %v357_v52, %s778_s12  ;;  %p682_p12 = scmp.ne.s32.totalorder %s430_s16, %s681_s26  ;;  %s685_s29 = sshll.u32 %s782_s28, 4  ;;  %s686_s29 = int_to_ptr.vmem [resolvable:$false] %s685_s29 }
 0x1f6   : > { %s687_s8 = scalar_lea.vmem %s686_s29, 32  ;;  %p688_p7 = scmp.lt.s32.totalorder %s430_s16, %s686_s29 }
 0x1f7   : > { %p683_p0 = pnand %p682_p12, %p1098_p11  ;;  %p689_p8 = scmp.lt.s32.totalorder %s687_s8, %s681_s26 }
 0x1f9   : > { %p684_p2 = pneg %p683_p0  ;;  %p690_p9 = por %p689_p8, %p688_p7 }
 0x1fb   : > { %p691_p1 = pnand %p690_p9, %p684_p2 }
 0x1fd   : > { %694 = shalt.err (!%p691_p1)
}
 0x1fe   : > { %s695_s13 = scalar_lea.hbm %s1006_s10, 16  ;;  %s699_s15 = scalar_lea.hbm %s1083_s5, 64 }
 0x1ff   : > { %p696_p3 = scmp.ne.s32.totalorder %s1006_s10, %s695_s13  ;;  %p700_p13 = scmp.lt.s32.totalorder %s1006_s10, %s1083_s5 }
 0x200   : > { %p701_p6 = scmp.lt.s32.totalorder %s699_s15, %s695_s13 }
 0x201   : > { %p697_p4 = pnand %p696_p3, %p1098_p11 }
 0x202   : > { %p702_p10 = por %p701_p6, %p700_p13 }
 0x203   : > { %p698_p5 = pneg %p697_p4 }
 0x205   : > { %p703_p12 = pnand %p702_p10, %p698_p5 }
 0x207   : > { %706 = shalt.err (!%p703_p12)
}
 0x208   : > { %570 = dma.vmem_to_hbm [thread:$0]  (%p1098_p11), %s430_s16, 16, %s1006_s10, %s980_s9  }
 0x209   : > { %s561_s9 = sshll.u32 %s835_s22, 5  ;;  %s1101_s10 = sshll.u32 %s913_s17, 1 }
 0x20a   : > { %s243_s7 = scalar_lea.vmem [#allocation5], %s1101_s10  ;;  %s401_s28 = scalar_lea.hbm %s1081_s3, %s561_s9 }
 0x20b   : > { %s403_s16 = sshll.u32 %s243_s7, 4  ;;  %s382_s29 = scalar_lea.sflag [#allocation4], %s913_s17  ;;  %s404_s16 = int_to_ptr.vmem [resolvable:$true] %s403_s16 }
 0x20c   : > { %s707_s8 = scalar_lea.vmem %s404_s16, 32  ;;  %s783_s22 = smov [#allocation5]  }
 0x20d   : > { %p708_p0 = scmp.ne.s32.totalorder %s404_s16, %s707_s8  ;;  %s711_s13 = sshll.u32 %s783_s22, 4  ;;  %s712_s13 = int_to_ptr.vmem [resolvable:$false] %s711_s13 }
 0x20e   : > { %s713_s12 = scalar_lea.vmem %s712_s13, 64  ;;  %p714_p8 = scmp.lt.s32.totalorder %s404_s16, %s712_s13 }
 0x20f   : > { %p709_p2 = pnand %p708_p0, %p1098_p11  ;;  %p715_p9 = scmp.lt.s32.totalorder %s713_s12, %s707_s8 }
 0x211   : > { %p710_p7 = pneg %p709_p2  ;;  %p716_p1 = por %p715_p9, %p714_p8 }
 0x213   : > { %p717_p3 = pnand %p716_p1, %p710_p7 }
 0x251   : > { %v345_v53 = vpop.permute.xlu0 %344  ;;  %v342_v54 = vpop.permute.xlu1 %341 }
 0x252   : > { %v350_v55 = vsel %vm291_vm2, %v951_v47, %v342_v54 }
 0x253   : > { %v351_v56 = vsel %vm293_vm3, %v350_v55, %v345_v53 }
 0x263   : > { %v348_v57 = vpop.permute.xlu1 %347  ;;  %v359_v58 = vpop.permute.xlu0 %358 }
 0x264   : > { %v352_v59 = vsel %vm295_vm4, %v351_v56, %v348_v57  ;;  %v367_v61 = vsel %vm291_vm2, %v967_v51, %v359_v58 }
 0x265   : > { %v373_v60 = vrot.slane %v352_v59, %v938_v21 }
 0x267   : > { %v362_v62 = vpop.permute.xlu1 %361  ;;  %v365_v63 = vpop.permute.xlu0 %364  ;;  %v374_v3 = vmul.f32 %v373_v60, %v923_v0 }
 0x268   : > { %v368_v1 = vsel %vm293_vm3, %v367_v61, %v362_v62 }
 0x269   : > { %v369_v2 = vsel %vm295_vm4, %v368_v1, %v365_v63 }
 0x26a   : > { %v378_v4 = vrot.slane %v369_v2, %v938_v21 }
 0x26c   : > { %v379_v5 = vadd.f32 %v378_v4, %v374_v3 }
 0x26e   : > { %380 = vst [vmem:[%s243_s7] sm:$0x3] %v379_v5 }
 0x26f   : > { %720 = shalt.err (!%p717_p3)
}
 0x270   : > { %s721_s23 = scalar_lea.hbm %s401_s28, 32  ;;  %s725_s25 = scalar_lea.hbm %s1081_s3, 128 }
 0x271   : > { %p722_p4 = scmp.ne.s32.totalorder %s401_s28, %s721_s23  ;;  %p726_p6 = scmp.lt.s32.totalorder %s401_s28, %s1081_s3 }
 0x272   : > { %p727_p10 = scmp.lt.s32.totalorder %s725_s25, %s721_s23 }
 0x273   : > { %p723_p5 = pnand %p722_p4, %p1098_p11 }
 0x274   : > { %p728_p12 = por %p727_p10, %p726_p6 }
 0x275   : > { %p724_p13 = pneg %p723_p5 }
 0x277   : > { %p729_p0 = pnand %p728_p12, %p724_p13 }
 0x279   : > { %732 = shalt.err (!%p729_p0)
}
 0x27a   : > { %568 = dma.vmem_to_hbm [thread:$0]  (%p1098_p11), %s404_s16, 32, %s401_s28, %s382_s29  }
 0x27b PF: > { %p589_p2 = scmp.ge.s32.totalorder %s775_s21, 2  ;;  %s441_s10 = sand.u32 1, %s763_s18  }
 0x27c   : > { %p1102_p7 = scmp.ne.s32.totalorder %s1093_s6, 0  ;;  %s442_s7 = scalar_lea.sflag [#allocation4], %s441_s10 }
 0x27e   : > { %p579_p8 = pnand %p589_p2, %p1102_p7 }
 0x280   : > { %p580_p9 = pneg %p579_p8 }
 0x282   : > { %754 = dma.done.wait (%p580_p9), %s442_s7, 32  }
 0x283   : > { %756 = vsyncadd (%p580_p9), %s442_s7, 4294967264  ;;  %s1103_s11 = sadd.s32 4294967294, %s775_s21  }
 0x284   : > { %s450_s26 = sand.u32 1, %s1103_s11  }
 0x285   : > { %s451_s8 = scalar_lea.sflag [#allocation7], %s450_s26 }
 0x286   : > { %758 = dma.done.wait (%p580_p9), %s451_s8, 32  }
 0x287   : > { %760 = vsyncadd (%p580_p9), %s451_s8, 4294967264  ;;  %p22_p11 = scmp.ge.s32.totalorder %s839_s24, 6   ;;  %s1104_s18 = smov %s767_s19 }
 0x288   : > { %s1105_s19 = smov %s771_s20  ;;  %s1106_s20 = smov %s851_s27 }
 0x289   : > { %s1107_s21 = smov %s839_s24  ;;  %24 = sbr.rel (!%p22_p11) target bundleno = 7 (0x7), region = 109 }
 0x28e   :  { %463 = vsyncpa [#allocation3], 1 }
 0x28f   :  { %465 = vsyncpa [#allocation3 + $0x1], 1 }
 0x290   :  { %466 = vsyncpa [#allocation4], 1 }
 0x291   :  { %468 = vsyncpa [#allocation4 + $0x1], 1 }
 0x292   :  { %469 = vsyncpa [#allocation7], 1 }
 0x293   :  { %471 = vsyncpa [#allocation7 + $0x1], 1 }

</bundles_post_ra>
